<compile_context>
chip_gen: v5e
topology: v5e:2x2
jax: 0.10.0
libtpu: 0.0.40
codegen_flags: <defaults>
</compile_context>

<pallas_src>
import functools

import numpy as np
import jax
import jax.numpy as jnp
from jax.experimental import pallas as pl
from jax.experimental.pallas import tpu as pltpu

# ImageNet normalization constants (lightly's imagenet_normalize).
IMAGENET_MEAN = np.array([0.485, 0.456, 0.406], dtype=np.float32)
IMAGENET_STD = np.array([0.229, 0.224, 0.225], dtype=np.float32)


def _bilinear_matrix(out_size: int, in_size: int) -> np.ndarray:
    """Row-interpolation matrix (out_size, in_size) for 2-tap bilinear resize,
    half-pixel centers (align_corners=False)."""
    scale = in_size / out_size
    src = (np.arange(out_size, dtype=np.float64) + 0.5) * scale - 0.5
    src = np.clip(src, 0.0, in_size - 1)
    lo = np.floor(src).astype(np.int64)
    hi = np.minimum(lo + 1, in_size - 1)
    frac = (src - lo).astype(np.float32)
    m = np.zeros((out_size, in_size), dtype=np.float32)
    for i in range(out_size):
        m[i, lo[i]] += 1.0 - frac[i]
        m[i, hi[i]] += frac[i]
    return m


def _build_constants(Sg: int, Sl: int, H: int, W: int):
    """Constants shared by all grid steps:
       rw_all: (W, Sg+Sl) fused column-resize matrix for both views, 1/255 folded in
       rh_g:   (Sg, H)    plain row-resize matrix for the global view
       rh_l:   (Sl, H)    plain row-resize matrix for the local view
    """
    rw_g = _bilinear_matrix(Sg, W).T                                  # (W, Sg)
    rw_l = _bilinear_matrix(Sl, W).T                                  # (W, Sl)
    rw_all = (np.concatenate([rw_g, rw_l], axis=1) * (1.0 / 255.0)).astype(np.float32)
    rh_g = _bilinear_matrix(Sg, H)                                    # (Sg, H)
    rh_l = _bilinear_matrix(Sl, H)                                    # (Sl, H)
    return jnp.asarray(rw_all), jnp.asarray(rh_g), jnp.asarray(rh_l)


def _fused_views_kernel(x_ref, rw_ref, rhg_ref, rhl_ref, og_ref, ol_ref,
                        tg_scr, tl_scr, *, bt, C, H, Sg, Sl):
    """One batch-tile (bt images) per grid step.

    x_ref:   (bt, C*H, W)   uint8 pixels in [0, 255]
    rw_ref:  (W, Sg+Sl)     fused column resize (1/255 folded in)
    rhg_ref: (Sg, H)        row resize, global view
    rhl_ref: (Sl, H)        row resize, local view
    og_ref:  (C*Sg, bt*Sg)  normalized global views, batch packed along lanes
    ol_ref:  (C*Sl, bt*Sl)  normalized local views, batch packed along lanes
    tg_scr:  (C*H, bt*Sg)   f32 scratch (stage-1 result, global columns)
    tl_scr:  (C*H, bt*Sl)   f32 scratch (stage-1 result, local columns)
    """
    # Stage 1: per-image u8->f32 cast + fused column resize for BOTH views.
    # Only one image's f32 slab is live at a time (caps VMEM/vreg pressure).
    for b in range(bt):
        xb = x_ref[b].astype(jnp.float32)                                   # (C*H, W)
        t = jnp.dot(xb, rw_ref[...], preferred_element_type=jnp.float32)    # (C*H, Sg+Sl)
        tg_scr[:, b * Sg:(b + 1) * Sg] = t[:, :Sg]
        tl_scr[:, b * Sl:(b + 1) * Sl] = t[:, Sg:Sg + Sl]

    # Stage 2: per-channel row resize over the whole lane-packed tile, with
    # per-channel 1/std and mean/std applied as compile-time scalars.
    for c in range(C):
        inv_std = float(1.0 / IMAGENET_STD[c])
        bias = float(IMAGENET_MEAN[c] / IMAGENET_STD[c])
        yg = jnp.dot(rhg_ref[...], tg_scr[c * H:(c + 1) * H, :],
                     preferred_element_type=jnp.float32)                    # (Sg, bt*Sg)
        og_ref[c * Sg:(c + 1) * Sg, :] = yg * inv_std - bias
        yl = jnp.dot(rhl_ref[...], tl_scr[c * H:(c + 1) * H, :],
                     preferred_element_type=jnp.float32)                    # (Sl, bt*Sl)
        ol_ref[c * Sl:(c + 1) * Sl, :] = yl * inv_std - bias


def _vmem_bytes_estimate(bt, C, H, W, Sg, Sl):
    per_image = (2 * C * H * W                         # u8 input block, double-buffered
                 + 4 * C * H * (Sg + Sl)               # stage-1 scratch columns
                 + 8 * C * (Sg * Sg + Sl * Sl))        # f32 outputs, double-buffered
    fixed = (8 * C * H * W                             # one image's live f32 slab (2x slack)
             + 8 * (W * (Sg + Sl) + Sg * H + Sl * H)   # constants, double-buffered
             + (1 << 20))                              # misc slack
    return fixed + bt * per_image


def _choose_batch_tile(B, C, H, W, Sg, Sl, budget_bytes):
    """Largest divisor of B whose VMEM footprint fits the budget; keeps >= 2
    grid steps when B > 1 so v7x can shard the 'parallel' axis over 2 TCs."""
    per_image = (2 * C * H * W + 4 * C * H * (Sg + Sl)
                 + 8 * C * (Sg * Sg + Sl * Sl))
    fixed = _vmem_bytes_estimate(0, C, H, W, Sg, Sl)
    bt_cap = max(1, (budget_bytes - fixed) // per_image)
    if B > 1:
        bt_cap = min(bt_cap, max(1, B // 2))
    bt = 1
    for d in range(1, B + 1):
        if B % d == 0 and d <= bt_cap:
            bt = d
    return int(bt)


def _fused_resize_and_normalize(images_u8: jnp.ndarray, global_size: int, local_size: int,
                                vmem_budget_bytes: int = 24 * 1024 * 1024):
    """images_u8: (B, C, H, W) uint8 -> ((B, C, Sg, Sg), (B, C, Sl, Sl)) float32."""
    B, C, H, W = images_u8.shape
    Sg, Sl = global_size, local_size

    rw_all, rh_g, rh_l = _build_constants(Sg, Sl, H, W)
    bt = _choose_batch_tile(B, C, H, W, Sg, Sl, vmem_budget_bytes)
    nb = B // bt

    # Free, contiguous reshape: present each image as a (C*H, W) slab.
    x = images_u8.reshape(B, C * H, W)

    kernel = functools.partial(_fused_views_kernel, bt=bt, C=C, H=H, Sg=Sg, Sl=Sl)

    flops = 2 * B * (C * H * W * (Sg + Sl) + C * (Sg * H * Sg + Sl * H * Sl))
    bytes_accessed = (B * C * H * W                                   # uint8 input
                      + 4 * B * C * (Sg * Sg + Sl * Sl)               # f32 outputs
                      + 4 * (W * (Sg + Sl) + Sg * H + Sl * H))        # constants

    vmem_limit = int(min(max(2 * _vmem_bytes_estimate(bt, C, H, W, Sg, Sl),
                             32 * 1024 * 1024),
                         48 * 1024 * 1024))

    out_g, out_l = pl.pallas_call(
        kernel,
        out_shape=(
            jax.ShapeDtypeStruct((nb, C * Sg, bt * Sg), jnp.float32),
            jax.ShapeDtypeStruct((nb, C * Sl, bt * Sl), jnp.float32),
        ),
        grid_spec=pltpu.PrefetchScalarGridSpec(
            num_scalar_prefetch=0,
            grid=(nb,),
            in_specs=[
                pl.BlockSpec((bt, C * H, W), lambda i: (i, 0, 0)),    # u8 image block
                pl.BlockSpec((W, Sg + Sl), lambda i: (0, 0)),         # rw_all (resident)
                pl.BlockSpec((Sg, H), lambda i: (0, 0)),              # rh_g   (resident)
                pl.BlockSpec((Sl, H), lambda i: (0, 0)),              # rh_l   (resident)
            ],
            out_specs=[
                pl.BlockSpec((pl.Squeezed(), C * Sg, bt * Sg), lambda i: (i, 0, 0)),
                pl.BlockSpec((pl.Squeezed(), C * Sl, bt * Sl), lambda i: (i, 0, 0)),
            ],
            scratch_shapes=[
                pltpu.VMEM((C * H, bt * Sg), jnp.float32),
                pltpu.VMEM((C * H, bt * Sl), jnp.float32),
            ]),
        compiler_params=pltpu.CompilerParams(
            dimension_semantics=("parallel",),
            vmem_limit_bytes=vmem_limit),
        cost_estimate=pl.CostEstimate(
            flops=flops, transcendentals=0, bytes_accessed=bytes_accessed),
    )(x, rw_all, rh_g, rh_l)

    # Layout-only plumbing back to NCHW (done outside the kernel).
    views_global = (out_g.reshape(nb, C, Sg, bt, Sg)
                    .transpose(0, 3, 1, 2, 4).reshape(B, C, Sg, Sg))
    views_local = (out_l.reshape(nb, C, Sl, bt, Sl)
                   .transpose(0, 3, 1, 2, 4).reshape(B, C, Sl, Sl))
    return views_global, views_local


def _location_to_nxn_grid(height: int, width: int, n: int, batch: int) -> jnp.ndarray:
    """Deterministic analog of lightly's location_to_NxN_grid for an identity
    (full-image) crop: cell-center coordinates (y, x), shape (B, N, N, 2)."""
    cell_h = height / n
    cell_w = width / n
    ys = (jnp.arange(n, dtype=jnp.float32) + 0.5) * cell_h
    xs = (jnp.arange(n, dtype=jnp.float32) + 0.5) * cell_w
    gy, gx = jnp.meshgrid(ys, xs, indexing="ij")
    grid = jnp.stack([gy, gx], axis=-1)                 # (N, N, 2)
    return jnp.broadcast_to(grid[None], (batch, n, n, 2))


def vicregl_collate_forward(images_u8, labels, fnames,
                            global_crop_size=16, local_crop_size=8,
                            global_grid_size=4, local_grid_size=2):
    """Deterministic VICRegL collate forward.

    images_u8: (B, 3, H, W) uint8 (decoded images, NCHW)
    Returns ((views_global, views_local, grids_global, grids_local),
             labels, fnames) mirroring the PyTorch module.
    """
    B, C, H, W = images_u8.shape
    views_global, views_local = _fused_resize_and_normalize(
        images_u8, global_crop_size, local_crop_size)

    grids_global = _location_to_nxn_grid(H, W, global_grid_size, B)
    grids_local = _location_to_nxn_grid(H, W, local_grid_size, B)

    labels_out = jnp.asarray(labels, dtype=jnp.int32)
    return (views_global, views_local, grids_global, grids_local), labels_out, fnames


if __name__ == "__main__":
    key = jax.random.PRNGKey(0)
    B, C, H, W = 2, 3, 32, 32
    Sg, Sl = 16, 8
    images = jax.random.randint(key, (B, C, H, W), 0, 256, dtype=jnp.int32).astype(jnp.uint8)
    labels = [0, 1]
    fnames = ["img_0.png", "img_1.png"]

    (vg, vl, gg, gl), lab, fn = vicregl_collate_forward(
        images, labels, fnames,
        global_crop_size=Sg, local_crop_size=Sl,
        global_grid_size=4, local_grid_size=2)
    jax.block_until_ready((vg, vl, gg, gl, lab))

    assert vg.shape == (B, C, Sg, Sg) and vg.dtype == jnp.float32
    assert vl.shape == (B, C, Sl, Sl) and vl.dtype == jnp.float32
    assert gg.shape == (B, 4, 4, 2)
    assert gl.shape == (B, 2, 2, 2)

    # Pure-numpy reference of resize + ToTensor (/255) + ImageNet Normalize.
    x_np = np.asarray(jax.device_get(images)).astype(np.float32)
    mean = IMAGENET_MEAN[None, :, None, None]
    std = IMAGENET_STD[None, :, None, None]

    def ref_view(out_size):
        rh = _bilinear_matrix(out_size, H)
        rw = _bilinear_matrix(out_size, W)
        r = np.einsum("sh,bchw,tw->bcst", rh, x_np, rw)
        return (r / 255.0 - mean) / std

    # Tolerance covers possible MXU bf16-pass rounding of the f32 matmuls on
    # uint8-scale inputs; any real indexing/weighting bug produces O(0.1+) errors.
    np.testing.assert_allclose(np.asarray(vg), ref_view(Sg), rtol=2e-2, atol=2e-2)
    np.testing.assert_allclose(np.asarray(vl), ref_view(Sl), rtol=2e-2, atol=2e-2)

    print("KERNEL_OK")
</pallas_src>

<mosaic_0001>
module attributes {stable_mosaic.version = 11 : i64} {
  func.func @_fused_views_kernel(%arg0: i32, %arg1: memref<1x96x32xi8, #tpu.memory_space<vmem>>, %arg2: memref<32x24xf32, #tpu.memory_space<vmem>>, %arg3: memref<16x32xf32, #tpu.memory_space<vmem>>, %arg4: memref<8x32xf32, #tpu.memory_space<vmem>>, %arg5: memref<1x48x16xf32, #tpu.memory_space<vmem>>, %arg6: memref<1x24x8xf32, #tpu.memory_space<vmem>>, %arg7: memref<96x16xf32, #tpu.memory_space<vmem>>, %arg8: memref<96x8xf32, #tpu.memory_space<vmem>>) attributes {dimension_semantics = [#tpu.dimension_semantics<parallel>], iteration_bounds = array<i64: 2>, scalar_prefetch = 0 : i64, scratch_operands = 2 : i64, tpu.core_type = #tpu.core_type<tc>, window_params = [{transform_indices = @transform_0, window_bounds = array<i64: 1, 96, 32>}, {pipeline_mode = #tpu.pipeline_mode<synchronous>, transform_indices = @transform_1, window_bounds = array<i64: 32, 24>}, {pipeline_mode = #tpu.pipeline_mode<synchronous>, transform_indices = @transform_2, window_bounds = array<i64: 16, 32>}, {pipeline_mode = #tpu.pipeline_mode<synchronous>, transform_indices = @transform_3, window_bounds = array<i64: 8, 32>}, {transform_indices = @transform_4, window_bounds = array<i64: 1, 48, 16>}, {transform_indices = @transform_5, window_bounds = array<i64: 1, 24, 8>}]} {
    %c0 = arith.constant 0 : index
    %c0_0 = arith.constant 0 : index
    %c0_1 = arith.constant 0 : index
    %0 = vector.load %arg1[%c0, %c0_0, %c0_1] : memref<1x96x32xi8, #tpu.memory_space<vmem>>, vector<1x96x32xi8>
    %1 = vector.shape_cast %0 : vector<1x96x32xi8> to vector<96x32xi8>
    %2 = arith.uitofp %1 : vector<96x32xi8> to vector<96x32xf32>
    %c0_2 = arith.constant 0 : index
    %c0_3 = arith.constant 0 : index
    %3 = vector.load %arg2[%c0_2, %c0_3] : memref<32x24xf32, #tpu.memory_space<vmem>>, vector<32x24xf32>
    %cst = arith.constant dense<0.000000e+00> : vector<96x24xf32>
    %4 = tpu.matmul %2, %3, %cst {dimension_numbers = #tpu.dot_dimension_numbers<[1], [0], [0], [1], [0, 0, 1, 1], [], []>} : vector<96x32xf32>, vector<32x24xf32>, vector<96x24xf32> -> vector<96x24xf32>
    %5 = vector.extract_strided_slice %4 {offsets = [0, 0], sizes = [96, 16], strides = [1, 1]} : vector<96x24xf32> to vector<96x16xf32>
    %c0_4 = arith.constant 0 : index
    %c0_5 = arith.constant 0 : index
    %6 = vector.load %arg7[%c0_4, %c0_5] : memref<96x16xf32, #tpu.memory_space<vmem>>, vector<96x16xf32>
    tpu.vector_store %arg7[%c0_4, %c0_5], %5 {strides = array<i32>} : memref<96x16xf32, #tpu.memory_space<vmem>>, vector<96x16xf32>,
    %7 = vector.extract_strided_slice %4 {offsets = [0, 16], sizes = [96, 8], strides = [1, 1]} : vector<96x24xf32> to vector<96x8xf32>
    %c0_6 = arith.constant 0 : index
    %c0_7 = arith.constant 0 : index
    %8 = vector.load %arg8[%c0_6, %c0_7] : memref<96x8xf32, #tpu.memory_space<vmem>>, vector<96x8xf32>
    tpu.vector_store %arg8[%c0_6, %c0_7], %7 {strides = array<i32>} : memref<96x8xf32, #tpu.memory_space<vmem>>, vector<96x8xf32>,
    %c0_8 = arith.constant 0 : index
    %c0_9 = arith.constant 0 : index
    %9 = vector.load %arg3[%c0_8, %c0_9] : memref<16x32xf32, #tpu.memory_space<vmem>>, vector<16x32xf32>
    %c0_10 = arith.constant 0 : index
    %c0_11 = arith.constant 0 : index
    %10 = vector.load %arg7[%c0_10, %c0_11] : memref<96x16xf32, #tpu.memory_space<vmem>>, vector<32x16xf32>
    %cst_12 = arith.constant dense<0.000000e+00> : vector<16x16xf32>
    %11 = tpu.matmul %9, %10, %cst_12 {dimension_numbers = #tpu.dot_dimension_numbers<[1], [0], [0], [1], [0, 0, 1, 1], [], []>} : vector<16x32xf32>, vector<32x16xf32>, vector<16x16xf32> -> vector<16x16xf32>
    %cst_13 = arith.constant 4.36681223 : f32
    %12 = vector.broadcast %cst_13 : f32 to vector<16x16xf32>
    %13 = arith.mulf %11, %12 : vector<16x16xf32>
    %cst_14 = arith.constant 2.11790395 : f32
    %14 = vector.broadcast %cst_14 : f32 to vector<16x16xf32>
    %15 = arith.subf %13, %14 : vector<16x16xf32>
    %c0_15 = arith.constant 0 : index
    %c0_16 = arith.constant 0 : index
    %c0_17 = arith.constant 0 : index
    %16 = vector.load %arg5[%c0_15, %c0_16, %c0_17] : memref<1x48x16xf32, #tpu.memory_space<vmem>>, vector<1x16x16xf32>
    %17 = vector.shape_cast %16 : vector<1x16x16xf32> to vector<16x16xf32>
    %18 = vector.shape_cast %15 : vector<16x16xf32> to vector<1x16x16xf32>
    tpu.vector_store %arg5[%c0_15, %c0_16, %c0_17], %18 {strides = array<i32>} : memref<1x48x16xf32, #tpu.memory_space<vmem>>, vector<1x16x16xf32>,
    %c0_18 = arith.constant 0 : index
    %c0_19 = arith.constant 0 : index
    %19 = vector.load %arg4[%c0_18, %c0_19] : memref<8x32xf32, #tpu.memory_space<vmem>>, vector<8x32xf32>
    %c0_20 = arith.constant 0 : index
    %c0_21 = arith.constant 0 : index
    %20 = vector.load %arg8[%c0_20, %c0_21] : memref<96x8xf32, #tpu.memory_space<vmem>>, vector<32x8xf32>
    %cst_22 = arith.constant dense<0.000000e+00> : vector<8x8xf32>
    %21 = tpu.matmul %19, %20, %cst_22 {dimension_numbers = #tpu.dot_dimension_numbers<[1], [0], [0], [1], [0, 0, 1, 1], [], []>} : vector<8x32xf32>, vector<32x8xf32>, vector<8x8xf32> -> vector<8x8xf32>
    %cst_23 = arith.constant 4.36681223 : f32
    %22 = vector.broadcast %cst_23 : f32 to vector<8x8xf32>
    %23 = arith.mulf %21, %22 : vector<8x8xf32>
    %cst_24 = arith.constant 2.11790395 : f32
    %24 = vector.broadcast %cst_24 : f32 to vector<8x8xf32>
    %25 = arith.subf %23, %24 : vector<8x8xf32>
    %c0_25 = arith.constant 0 : index
    %c0_26 = arith.constant 0 : index
    %c0_27 = arith.constant 0 : index
    %26 = vector.load %arg6[%c0_25, %c0_26, %c0_27] : memref<1x24x8xf32, #tpu.memory_space<vmem>>, vector<1x8x8xf32>
    %27 = vector.shape_cast %26 : vector<1x8x8xf32> to vector<8x8xf32>
    %28 = vector.shape_cast %25 : vector<8x8xf32> to vector<1x8x8xf32>
    tpu.vector_store %arg6[%c0_25, %c0_26, %c0_27], %28 {strides = array<i32>} : memref<1x24x8xf32, #tpu.memory_space<vmem>>, vector<1x8x8xf32>,
    %c0_28 = arith.constant 0 : index
    %c0_29 = arith.constant 0 : index
    %29 = vector.load %arg3[%c0_28, %c0_29] : memref<16x32xf32, #tpu.memory_space<vmem>>, vector<16x32xf32>
    %c32 = arith.constant 32 : index
    %c0_30 = arith.constant 0 : index
    %30 = vector.load %arg7[%c32, %c0_30] : memref<96x16xf32, #tpu.memory_space<vmem>>, vector<32x16xf32>
    %cst_31 = arith.constant dense<0.000000e+00> : vector<16x16xf32>
    %31 = tpu.matmul %29, %30, %cst_31 {dimension_numbers = #tpu.dot_dimension_numbers<[1], [0], [0], [1], [0, 0, 1, 1], [], []>} : vector<16x32xf32>, vector<32x16xf32>, vector<16x16xf32> -> vector<16x16xf32>
    %cst_32 = arith.constant 4.46428537 : f32
    %32 = vector.broadcast %cst_32 : f32 to vector<16x16xf32>
    %33 = arith.mulf %31, %32 : vector<16x16xf32>
    %cst_33 = arith.constant 2.03571415 : f32
    %34 = vector.broadcast %cst_33 : f32 to vector<16x16xf32>
    %35 = arith.subf %33, %34 : vector<16x16xf32>
    %c0_34 = arith.constant 0 : index
    %c16 = arith.constant 16 : index
    %c0_35 = arith.constant 0 : index
    %36 = vector.load %arg5[%c0_34, %c16, %c0_35] : memref<1x48x16xf32, #tpu.memory_space<vmem>>, vector<1x16x16xf32>
    %37 = vector.shape_cast %36 : vector<1x16x16xf32> to vector<16x16xf32>
    %38 = vector.shape_cast %35 : vector<16x16xf32> to vector<1x16x16xf32>
    tpu.vector_store %arg5[%c0_34, %c16, %c0_35], %38 {strides = array<i32>} : memref<1x48x16xf32, #tpu.memory_space<vmem>>, vector<1x16x16xf32>,
    %c0_36 = arith.constant 0 : index
    %c0_37 = arith.constant 0 : index
    %39 = vector.load %arg4[%c0_36, %c0_37] : memref<8x32xf32, #tpu.memory_space<vmem>>, vector<8x32xf32>
    %c32_38 = arith.constant 32 : index
    %c0_39 = arith.constant 0 : index
    %40 = vector.load %arg8[%c32_38, %c0_39] : memref<96x8xf32, #tpu.memory_space<vmem>>, vector<32x8xf32>
    %cst_40 = arith.constant dense<0.000000e+00> : vector<8x8xf32>
    %41 = tpu.matmul %39, %40, %cst_40 {dimension_numbers = #tpu.dot_dimension_numbers<[1], [0], [0], [1], [0, 0, 1, 1], [], []>} : vector<8x32xf32>, vector<32x8xf32>, vector<8x8xf32> -> vector<8x8xf32>
    %cst_41 = arith.constant 4.46428537 : f32
    %42 = vector.broadcast %cst_41 : f32 to vector<8x8xf32>
    %43 = arith.mulf %41, %42 : vector<8x8xf32>
    %cst_42 = arith.constant 2.03571415 : f32
    %44 = vector.broadcast %cst_42 : f32 to vector<8x8xf32>
    %45 = arith.subf %43, %44 : vector<8x8xf32>
    %c0_43 = arith.constant 0 : index
    %c8 = arith.constant 8 : index
    %c0_44 = arith.constant 0 : index
    %46 = vector.load %arg6[%c0_43, %c8, %c0_44] : memref<1x24x8xf32, #tpu.memory_space<vmem>>, vector<1x8x8xf32>
    %47 = vector.shape_cast %46 : vector<1x8x8xf32> to vector<8x8xf32>
    %48 = vector.shape_cast %45 : vector<8x8xf32> to vector<1x8x8xf32>
    tpu.vector_store %arg6[%c0_43, %c8, %c0_44], %48 {strides = array<i32>} : memref<1x24x8xf32, #tpu.memory_space<vmem>>, vector<1x8x8xf32>,
    %c0_45 = arith.constant 0 : index
    %c0_46 = arith.constant 0 : index
    %49 = vector.load %arg3[%c0_45, %c0_46] : memref<16x32xf32, #tpu.memory_space<vmem>>, vector<16x32xf32>
    %c64 = arith.constant 64 : index
    %c0_47 = arith.constant 0 : index
    %50 = vector.load %arg7[%c64, %c0_47] : memref<96x16xf32, #tpu.memory_space<vmem>>, vector<32x16xf32>
    %cst_48 = arith.constant dense<0.000000e+00> : vector<16x16xf32>
    %51 = tpu.matmul %49, %50, %cst_48 {dimension_numbers = #tpu.dot_dimension_numbers<[1], [0], [0], [1], [0, 0, 1, 1], [], []>} : vector<16x32xf32>, vector<32x16xf32>, vector<16x16xf32> -> vector<16x16xf32>
    %cst_49 = arith.constant 4.44444466 : f32
    %52 = vector.broadcast %cst_49 : f32 to vector<16x16xf32>
    %53 = arith.mulf %51, %52 : vector<16x16xf32>
    %cst_50 = arith.constant 1.80444443 : f32
    %54 = vector.broadcast %cst_50 : f32 to vector<16x16xf32>
    %55 = arith.subf %53, %54 : vector<16x16xf32>
    %c0_51 = arith.constant 0 : index
    %c32_52 = arith.constant 32 : index
    %c0_53 = arith.constant 0 : index
    %56 = vector.load %arg5[%c0_51, %c32_52, %c0_53] : memref<1x48x16xf32, #tpu.memory_space<vmem>>, vector<1x16x16xf32>
    %57 = vector.shape_cast %56 : vector<1x16x16xf32> to vector<16x16xf32>
    %58 = vector.shape_cast %55 : vector<16x16xf32> to vector<1x16x16xf32>
    tpu.vector_store %arg5[%c0_51, %c32_52, %c0_53], %58 {strides = array<i32>} : memref<1x48x16xf32, #tpu.memory_space<vmem>>, vector<1x16x16xf32>,
    %c0_54 = arith.constant 0 : index
    %c0_55 = arith.constant 0 : index
    %59 = vector.load %arg4[%c0_54, %c0_55] : memref<8x32xf32, #tpu.memory_space<vmem>>, vector<8x32xf32>
    %c64_56 = arith.constant 64 : index
    %c0_57 = arith.constant 0 : index
    %60 = vector.load %arg8[%c64_56, %c0_57] : memref<96x8xf32, #tpu.memory_space<vmem>>, vector<32x8xf32>
    %cst_58 = arith.constant dense<0.000000e+00> : vector<8x8xf32>
    %61 = tpu.matmul %59, %60, %cst_58 {dimension_numbers = #tpu.dot_dimension_numbers<[1], [0], [0], [1], [0, 0, 1, 1], [], []>} : vector<8x32xf32>, vector<32x8xf32>, vector<8x8xf32> -> vector<8x8xf32>
    %cst_59 = arith.constant 4.44444466 : f32
    %62 = vector.broadcast %cst_59 : f32 to vector<8x8xf32>
    %63 = arith.mulf %61, %62 : vector<8x8xf32>
    %cst_60 = arith.constant 1.80444443 : f32
    %64 = vector.broadcast %cst_60 : f32 to vector<8x8xf32>
    %65 = arith.subf %63, %64 : vector<8x8xf32>
    %c0_61 = arith.constant 0 : index
    %c16_62 = arith.constant 16 : index
    %c0_63 = arith.constant 0 : index
    %66 = vector.load %arg6[%c0_61, %c16_62, %c0_63] : memref<1x24x8xf32, #tpu.memory_space<vmem>>, vector<1x8x8xf32>
    %67 = vector.shape_cast %66 : vector<1x8x8xf32> to vector<8x8xf32>
    %68 = vector.shape_cast %65 : vector<8x8xf32> to vector<1x8x8xf32>
    tpu.vector_store %arg6[%c0_61, %c16_62, %c0_63], %68 {strides = array<i32>} : memref<1x24x8xf32, #tpu.memory_space<vmem>>, vector<1x8x8xf32>,
    return
  }
  func.func @transform_0(%arg0: i32) -> (i32, i32, i32) {
    %c0_i32 = arith.constant 0 : i32
    %c0_i32_0 = arith.constant 0 : i32
    %c0_i32_1 = arith.constant 0 : i32
    return %arg0, %c0_i32, %c0_i32_0 : i32, i32, i32
  }
  func.func @transform_1(%arg0: i32) -> (i32, i32) {
    %c0_i32 = arith.constant 0 : i32
    %c0_i32_0 = arith.constant 0 : i32
    %c0_i32_1 = arith.constant 0 : i32
    return %c0_i32, %c0_i32_0 : i32, i32
  }
  func.func @transform_2(%arg0: i32) -> (i32, i32) {
    %c0_i32 = arith.constant 0 : i32
    %c0_i32_0 = arith.constant 0 : i32
    %c0_i32_1 = arith.constant 0 : i32
    return %c0_i32, %c0_i32_0 : i32, i32
  }
  func.func @transform_3(%arg0: i32) -> (i32, i32) {
    %c0_i32 = arith.constant 0 : i32
    %c0_i32_0 = arith.constant 0 : i32
    %c0_i32_1 = arith.constant 0 : i32
    return %c0_i32, %c0_i32_0 : i32, i32
  }
  func.func @transform_4(%arg0: i32) -> (i32, i32, i32) {
    %c0_i32 = arith.constant 0 : i32
    %c0_i32_0 = arith.constant 0 : i32
    %c0_i32_1 = arith.constant 0 : i32
    return %arg0, %c0_i32, %c0_i32_0 : i32, i32, i32
  }
  func.func @transform_5(%arg0: i32) -> (i32, i32, i32) {
    %c0_i32 = arith.constant 0 : i32
    %c0_i32_0 = arith.constant 0 : i32
    %c0_i32_1 = arith.constant 0 : i32
    return %arg0, %c0_i32, %c0_i32_0 : i32, i32, i32
  }
}

</mosaic_0001>

<bundles_post_ra>
// kernel: tpu_custom_call.1
= control target key start
LH: loop header
LB: loop body
LE: loop exit
PB: predicated region body
PF: predicated region fallthrough
CT: control target
= control target key end

     0   :  { %s847_s18 = smov 0   ;;  %s962_s0 = inlined_call_operand.vmem [shape: u8[2,96,32], index: 0, kind: input, shape index: {}]   ;;  %s963_s1 = inlined_call_operand.vmem [shape: f32[32,24], index: 1, kind: input, shape index: {}]   ;;  %s964_s2 = inlined_call_operand.vmem [shape: f32[16,32], index: 2, kind: input, shape index: {}]   ;;  %s965_s3 = inlined_call_operand.vmem [shape: f32[8,32], index: 3, kind: input, shape index: {}]   ;;  %s966_s4 = inlined_call_operand.vmem [shape: f32[2,48,16], index: 4, kind: output, shape index: {0}]   ;;  %s967_s5 = inlined_call_operand.vmem [shape: f32[2,24,8], index: 5, kind: output, shape index: {1}]  }
   0x1 LB: > { %s749_s19 = sadd.s32 4294967295, %s814_s18   ;;  %p753_p0 = scmp.ge.s32.totalorder %s814_s18, 1  ;;  %s814_s18 = sphi %s847_s18, %s16_s18  }
   0x2   : > { %p190_p1 = scmp.lt.s32.totalorder %s814_s18, 3 }
   0x4   : > { %p191_p2 = pnand %p753_p0, %p190_p1 }
   0x5   : > { %p223_p3 = scmp.lt.s32.totalorder (!%p191_p2), %s749_s19, 1  ;;  %s816_s7 = smov (!%p191_p2), 112  }
   0x6   : > { %194 = sbr.rel (%p191_p2) target bundleno = 461 (0x1cd), region = 36 }
   0xb   : > { %v280_v0 = vld [vmem:[%s963_s1 + $0x18] sm:$0xff]  ;;  %v279_v1 = vld [vmem:[%s963_s1 + $0x10] sm:$0xff]  ;;  %v278_v2 = vld [vmem:[%s963_s1 + $0x8] sm:$0xff]  ;;  %s969_s19 = smov (!%p223_p3, %s749_s19), 1  ;;  %vm281_vm0 = vcmask 261120   ;;  %vm371_vm1 = vcmask 130048  }
   0xc   : > { %330 = vmatpush.msra.mxu0 %v280_v0  ;;  %789 = vmatpush.msra.mxu2 %v280_v0  ;;  %v277_v3 = vld [vmem:[%s963_s1] sm:$0xff]  ;;  %s797_s28 = smul.u32 24, %s969_s19  ;;  %vm432_vm2 = vcmask 64512  }
   0xd   : > { %790 = vmatpush.msra.mxu3 %v280_v0  ;;  %s798_s14 = smul.u32 48, %s969_s19 }
   0xe   : > { %331 = vmatpush.msra.mxu0 %v279_v1  ;;  %791 = vmatpush.msra.mxu2 %v279_v1  ;;  %s227_s6 = scalar_lea.vmem %s962_s0, %s797_s28  ;;  %s237_s22 = scalar_lea.vmem %s967_s5, %s797_s28 }
   0xf   : > { %792 = vmatpush.msra.mxu3 %v279_v1  ;;  %v238_v4 = vld [vmem:[%s227_s6] sm:$0xff]  ;;  %v239_v5 = vld [vmem:[%s227_s6 + $0x8] sm:$0xff]  ;;  %v240_v6 = vld [vmem:[%s227_s6 + $0x10] sm:$0xff]  ;;  %s232_s17 = scalar_lea.vmem %s966_s4, %s798_s14 }
  0x10   : > { %332 = vmatpush.msra.mxu0 %v278_v2  ;;  %793 = vmatpush.msra.mxu2 %v278_v2  ;;  %v241_v7 = vunpack.c.0.s8 %v238_v4  ;;  %v247_v8 = vunpack.c.2.s8 %v239_v5  ;;  %v249_v9 = vunpack.c.0.s8 %v240_v6  ;;  %v242_v10 = vunpack.c.1.s8 %v238_v4 }
  0x11   : > { %794 = vmatpush.msra.mxu3 %v278_v2  ;;  %v248_v14 = vunpack.c.3.s8 %v239_v5  ;;  %v250_v15 = vunpack.c.1.s8 %v240_v6  ;;  %v243_v24 = vunpack.c.2.s8 %v238_v4  ;;  %v251_v26 = vunpack.c.2.s8 %v240_v6 }
  0x12   : > { %333 = vmatpush.msra.mxu0 %v277_v3  ;;  %795 = vmatpush.msra.mxu2 %v277_v3  ;;  %v253_v11 = vand.u32 255, %v241_v7  ;;  %v259_v12 = vand.u32 255, %v247_v8  ;;  %v261_v13 = vand.u32 255, %v249_v9  ;;  %v254_v19 = vand.u32 255, %v242_v10  ;;  %v445_v7 = vld [vmem:[%s964_s2] sm:$0xff]  ;;  %v446_v10 = vld [vmem:[%s964_s2 + $0x8] sm:$0xff] }
  0x13   : > { %796 = vmatpush.msra.mxu3 %v277_v3  ;;  %v260_v20 = vand.u32 255, %v248_v14  ;;  %v262_v21 = vand.u32 255, %v250_v15  ;;  %v255_v27 = vand.u32 255, %v243_v24  ;;  %v263_v28 = vand.u32 255, %v251_v26 }
  0x14   : > { %v265_v16 = vcvt.s32.f32 %v253_v11  ;;  %v271_v17 = vcvt.s32.f32 %v259_v12  ;;  %v273_v18 = vcvt.s32.f32 %v261_v13  ;;  %v266_v22 = vcvt.s32.f32 %v254_v19 }
  0x15   : > { %v272_v23 = vcvt.s32.f32 %v260_v20  ;;  %v274_v25 = vcvt.s32.f32 %v262_v21  ;;  %v267_v29 = vcvt.s32.f32 %v255_v27  ;;  %v244_v30 = vunpack.c.3.s8 %v238_v4  ;;  %v486_v20 = vld [vmem:[%s965_s3] sm:$0xff] }
  0x16   : > { %757 = vmatmul.msk.f32.vlgmr.msra.gmra.mxu0 %vm281_vm0, %v265_v16  ;;  %763 = vmatmul.msk.f32.vlgmr.msra.gmra.mxu2 %vm281_vm0, %v271_v17  ;;  %v275_v31 = vcvt.s32.f32 %v263_v28  ;;  %v252_v32 = vunpack.c.3.s8 %v240_v6  ;;  %v245_v36 = vunpack.c.0.s8 %v239_v5  ;;  %v246_v40 = vunpack.c.1.s8 %v239_v5 }
  0x17   : > { %765 = vmatmul.msk.f32.vlgmr.msra.gmra.mxu3 %vm281_vm0, %v273_v18  ;;  %v256_v33 = vand.u32 255, %v244_v30 }
  0x18   : > { %v264_v34 = vand.u32 255, %v252_v32  ;;  %v257_v38 = vand.u32 255, %v245_v36  ;;  %v258_v41 = vand.u32 255, %v246_v40 }
  0x19   : > { %v268_v35 = vcvt.s32.f32 %v256_v33 }
  0x1a   : > { %v276_v37 = vcvt.s32.f32 %v264_v34  ;;  %v269_v39 = vcvt.s32.f32 %v257_v38  ;;  %v270_v42 = vcvt.s32.f32 %v258_v41 }
  0x1e   : > { %758 = vmatmul.msk.f32.gmra.mxu0 %vm281_vm0, %v266_v22  ;;  %764 = vmatmul.msk.f32.gmra.mxu2 %vm281_vm0, %v272_v23 }
  0x1f   : > { %766 = vmatmul.msk.f32.gmra.mxu3 %vm281_vm0, %v274_v25 }
  0x26   : > { %759 = vmatmul.msk.f32.gmra.mxu0 %vm281_vm0, %v267_v29 }
  0x27   : > { %767 = vmatmul.msk.f32.gmra.mxu3 %vm281_vm0, %v275_v31 }
  0x2e   : > { %760 = vmatmul.msk.f32.gmra.mxu0 %vm281_vm0, %v268_v35 }
  0x2f   : > { %768 = vmatmul.msk.f32.gmra.mxu3 %vm281_vm0, %v276_v37 }
  0x36   : > { %761 = vmatmul.msk.f32.gmra.mxu0 %vm281_vm0, %v269_v39 }
  0x3e   : > { %762 = vmatmul.msk.f32.gmra.mxu0 %vm281_vm0, %v270_v42 }
  0x93   : > { %v335_v43 = vpop.f32.mrf.mxu0 }
  0x94   : > { %372 = vst.msk [vmem:[#allocation2] sm:$0xff] %vm371_vm1, %v335_v43 }
  0x99   : > { %v353_v44 = vpop.f32.mrf.mxu2 }
  0x9a   : > { %378 = vst.msk [vmem:[#allocation2 + $0x30] sm:$0xff] %vm371_vm1, %v353_v44  ;;  %v359_v45 = vpop.f32.mrf.mxu3 }
  0x9b   : > { %380 = vst.msk [vmem:[#allocation2 + $0x40] sm:$0xff] %vm371_vm1, %v359_v45  ;;  %v338_v46 = vpop.f32.mrf.mxu0  ;;  %v447_v59 = vld [vmem:[#allocation2] sm:$0xff] }
  0x9c   : > { %373 = vst.msk [vmem:[#allocation2 + $0x8] sm:$0xff] %vm371_vm1, %v338_v46  ;;  %398 = vrot.lane.b32.xlu1 %v338_v46, %s816_s7 }
  0xa1   : > { %v356_v47 = vpop.f32.mrf.mxu2  ;;  %v521_v51 = vld [vmem:[#allocation2 + $0x30] sm:$0xff] }
  0xa2   : > { %379 = vst.msk [vmem:[#allocation2 + $0x38] sm:$0xff] %vm371_vm1, %v356_v47  ;;  %v362_v48 = vpop.f32.mrf.mxu3  ;;  %410 = vrot.lane.b32.xlu2 %v356_v47, %s816_s7  ;;  %v591_v0 = vld [vmem:[#allocation2 + $0x40] sm:$0xff] }
  0xa3   : > { %381 = vst.msk [vmem:[#allocation2 + $0x48] sm:$0xff] %vm371_vm1, %v362_v48  ;;  %v341_v49 = vpop.f32.mrf.mxu0  ;;  %v448_v58 = vld [vmem:[#allocation2 + $0x8] sm:$0xff] }
  0xa4   : > { %374 = vst.msk [vmem:[#allocation2 + $0x10] sm:$0xff] %vm371_vm1, %v341_v49  ;;  %396 = vrot.lane.b32.xlu1 %v335_v43, %s816_s7 }
  0xa9   : > { %v522_v50 = vld [vmem:[#allocation2 + $0x38] sm:$0xff] }
  0xaa   : > { %v365_v52 = vpop.f32.mrf.mxu3  ;;  %408 = vrot.lane.b32.xlu2 %v353_v44, %s816_s7  ;;  %541 = vmatpush.msrb.mxu3 %v522_v50  ;;  %v592_v63 = vld [vmem:[#allocation2 + $0x48] sm:$0xff] }
  0xab   : > { %382 = vst.msk [vmem:[#allocation2 + $0x50] sm:$0xff] %vm371_vm1, %v365_v52  ;;  %v344_v53 = vpop.f32.mrf.mxu0  ;;  %v449_v57 = vld [vmem:[#allocation2 + $0x10] sm:$0xff] }
  0xac   : > { %375 = vst.msk [vmem:[#allocation2 + $0x18] sm:$0xff] %vm371_vm1, %v344_v53  ;;  %402 = vrot.lane.b32.xlu0 %v344_v53, %s816_s7  ;;  %542 = vmatpush.msrb.mxu3 %v521_v51 }
  0xb2   : > { %v368_v54 = vpop.f32.mrf.mxu3  ;;  %v593_v61 = vld [vmem:[#allocation2 + $0x50] sm:$0xff] }
  0xb3   : > { %383 = vst.msk [vmem:[#allocation2 + $0x58] sm:$0xff] %vm371_vm1, %v368_v54  ;;  %418 = vrot.lane.b32.xlu2 %v368_v54, %s816_s7  ;;  %v347_v55 = vpop.f32.mrf.mxu0  ;;  %v450_v56 = vld [vmem:[#allocation2 + $0x18] sm:$0xff] }
  0xb4   : > { %376 = vst.msk [vmem:[#allocation2 + $0x20] sm:$0xff] %vm371_vm1, %v347_v55  ;;  %400 = vrot.lane.b32.xlu0 %v341_v49, %s816_s7  ;;  %469 = vmatpush.msra.mxu1 %v450_v56 }
  0xb5   : > { %404 = vrot.lane.b32.xlu1 %v347_v55, %s816_s7 }
  0xb6   : > { %470 = vmatpush.msra.mxu1 %v449_v57 }
  0xb8   : > { %471 = vmatpush.msra.mxu1 %v448_v58 }
  0xba   : > { %472 = vmatpush.msra.mxu1 %v447_v59  ;;  %v594_v60 = vld [vmem:[#allocation2 + $0x58] sm:$0xff] }
  0xbb   : > { %412 = vrot.lane.b32.xlu2 %v359_v45, %s816_s7  ;;  %v350_v62 = vpop.f32.mrf.mxu0  ;;  %v519_v2 = vld [vmem:[#allocation2 + $0x20] sm:$0xff]  ;;  %769 = vmatmul.msk.f32.vlgmr.msra.gmra.mxu1 %vm281_vm0, %v445_v7 }
  0xbc   : > { %613 = vmatpush.msrb.mxu1 %v594_v60  ;;  %377 = vst.msk [vmem:[#allocation2 + $0x28] sm:$0xff] %vm371_vm1, %v350_v62  ;;  %406 = vrot.lane.b32.xlu0 %v350_v62, %s816_s7 }
  0xbd   : > { %414 = vrot.lane.b32.xlu1 %v362_v48, %s816_s7 }
  0xbe   : > { %614 = vmatpush.msrb.mxu1 %v593_v61 }
  0xc0   : > { %615 = vmatpush.msrb.mxu1 %v592_v63 }
  0xc2   : > { %616 = vmatpush.msrb.mxu1 %v591_v0 }
  0xc3   : > { %v520_v1 = vld [vmem:[#allocation2 + $0x28] sm:$0xff]  ;;  %770 = vmatmul.msk.f32.gmra.mxu1 %vm281_vm0, %v446_v10 }
  0xc4   : > { %416 = vrot.lane.b32.xlu0 %v365_v52, %s816_s7  ;;  %543 = vmatpush.msrb.mxu3 %v520_v1 }
  0xc6   : > { %544 = vmatpush.msrb.mxu3 %v519_v2 }
  0xc7   : > { %775 = vmatmul.msk.f32.vlgmr.msrb.gmra.mxu3 %vm281_vm0, %v445_v7 }
  0xcb   : > { %781 = vmatmul.msk.f32.vlgmr.msrb.gmra.mxu1 %vm281_vm0, %v445_v7 }
  0xcf   : > { %776 = vmatmul.msk.f32.gmra.mxu3 %vm281_vm0, %v446_v10 }
  0xd3   : > { %782 = vmatmul.msk.f32.gmra.mxu1 %vm281_vm0, %v446_v10 }
  0xfc   : > { %v411_v3 = vpop.permute.xlu2 %410 }
  0xfd   : > { %440 = vst.msk [vmem:[#allocation3 + $0x38] sm:$0xff] %vm432_vm2, %v411_v3 }
 0x104   : > { %v409_v4 = vpop.permute.xlu2 %408  ;;  %v562_v21 = vld [vmem:[#allocation3 + $0x38] sm:$0xff] }
 0x105   : > { %439 = vst.msk [vmem:[#allocation3 + $0x30] sm:$0xff] %vm432_vm2, %v409_v4 }
 0x10c   : > { %v561_v22 = vld [vmem:[#allocation3 + $0x30] sm:$0xff] }
 0x10d   : > { %v419_v5 = vpop.permute.xlu2 %418 }
 0x10e   : > { %444 = vst.msk [vmem:[#allocation3 + $0x58] sm:$0xff] %vm432_vm2, %v419_v5  ;;  %v399_v6 = vpop.permute.xlu1 %398 }
 0x10f   : > { %434 = vst.msk [vmem:[#allocation3 + $0x8] sm:$0xff] %vm432_vm2, %v399_v6 }
 0x115   : > { %v413_v8 = vpop.permute.xlu2 %412  ;;  %v634_v25 = vld [vmem:[#allocation3 + $0x58] sm:$0xff] }
 0x116   : > { %441 = vst.msk [vmem:[#allocation3 + $0x40] sm:$0xff] %vm432_vm2, %v413_v8  ;;  %v397_v9 = vpop.permute.xlu1 %396  ;;  %v488_v18 = vld [vmem:[#allocation3 + $0x8] sm:$0xff] }
 0x117   : > { %433 = vst.msk [vmem:[#allocation3] sm:$0xff] %vm432_vm2, %v397_v9 }
 0x11d   : > { %v631_v29 = vld [vmem:[#allocation3 + $0x40] sm:$0xff] }
 0x11e   : > { %v403_v11 = vpop.permute.xlu0 %402  ;;  %v487_v19 = vld [vmem:[#allocation3] sm:$0xff] }
 0x11f   : > { %436 = vst.msk [vmem:[#allocation3 + $0x18] sm:$0xff] %vm432_vm2, %v403_v11 }
 0x126   : > { %v401_v12 = vpop.permute.xlu0 %400  ;;  %v490_v13 = vld [vmem:[#allocation3 + $0x18] sm:$0xff] }
 0x127   : > { %435 = vst.msk [vmem:[#allocation3 + $0x10] sm:$0xff] %vm432_vm2, %v401_v12  ;;  %506 = vmatpush.msrb.mxu2 %v490_v13  ;;  %v405_v14 = vpop.permute.xlu1 %404 }
 0x128   : > { %437 = vst.msk [vmem:[#allocation3 + $0x20] sm:$0xff] %vm432_vm2, %v405_v14 }
 0x12e   : > { %v407_v15 = vpop.permute.xlu0 %406  ;;  %v489_v16 = vld [vmem:[#allocation3 + $0x10] sm:$0xff] }
 0x12f   : > { %438 = vst.msk [vmem:[#allocation3 + $0x28] sm:$0xff] %vm432_vm2, %v407_v15  ;;  %507 = vmatpush.msrb.mxu2 %v489_v16  ;;  %v415_v17 = vpop.permute.xlu1 %414  ;;  %v559_v26 = vld [vmem:[#allocation3 + $0x20] sm:$0xff] }
 0x130   : > { %442 = vst.msk [vmem:[#allocation3 + $0x48] sm:$0xff] %vm432_vm2, %v415_v17 }
 0x131   : > { %508 = vmatpush.msrb.mxu2 %v488_v18 }
 0x133   : > { %509 = vmatpush.msrb.mxu2 %v487_v19 }
 0x134   : > { %773 = vmatmul.msk.f32.vlgmr.msrb.gmra.mxu2 %vm281_vm0, %v486_v20 }
 0x135   : > { %578 = vmatpush.msra.mxu2 %v562_v21 }
 0x136   : > { %v417_v23 = vpop.permute.xlu0 %416  ;;  %v560_v24 = vld [vmem:[#allocation3 + $0x28] sm:$0xff] }
 0x137   : > { %579 = vmatpush.msra.mxu2 %v561_v22  ;;  %443 = vst.msk [vmem:[#allocation3 + $0x50] sm:$0xff] %vm432_vm2, %v417_v23  ;;  %v632_v28 = vld [vmem:[#allocation3 + $0x48] sm:$0xff] }
 0x138   : > { %v474_v30 = vpop.f32.mrf.mxu1 }
 0x139   : > { %580 = vmatpush.msra.mxu2 %v560_v24  ;;  %v480_v31 = vmul.f32 4.366812, %v474_v30 }
 0x13b   : > { %581 = vmatpush.msra.mxu2 %v559_v26  ;;  %v771_v32 = vadd.f32 -2.117904, %v480_v31 }
 0x13c   : > { %779 = vmatmul.msk.f32.vlgmr.msra.gmra.mxu2 %vm281_vm0, %v486_v20 }
 0x13d   : > { %650 = vmatpush.msrb.mxu2 %v634_v25  ;;  %484 = vst.msk [vmem:[%s232_s17] sm:$0xff] %vm371_vm1, %v771_v32 }
 0x13e   : > { %v633_v27 = vld [vmem:[#allocation3 + $0x50] sm:$0xff] }
 0x13f   : > { %651 = vmatpush.msrb.mxu2 %v633_v27 }
 0x140   : > { %v477_v33 = vpop.f32.mrf.mxu1 }
 0x141   : > { %652 = vmatpush.msrb.mxu2 %v632_v28  ;;  %v481_v34 = vmul.f32 4.366812, %v477_v33 }
 0x143   : > { %653 = vmatpush.msrb.mxu2 %v631_v29  ;;  %v772_v35 = vadd.f32 -2.117904, %v481_v34 }
 0x144   : > { %785 = vmatmul.msk.f32.vlgmr.msrb.gmra.mxu2 %vm281_vm0, %v486_v20 }
 0x145   : > { %485 = vst.msk [vmem:[%s232_s17 + $0x8] sm:$0xff] %vm371_vm1, %v772_v35 }
 0x148   : > { %v618_v39 = vpop.f32.mrf.mxu1 }
 0x149   : > { %v624_v40 = vmul.f32 4.4444447, %v618_v39 }
 0x14a   : > { %v546_v36 = vpop.f32.mrf.mxu3 }
 0x14b   : > { %v552_v37 = vmul.f32 4.4642854, %v546_v36  ;;  %v783_v41 = vadd.f32 -1.8044444, %v624_v40 }
 0x14d   : > { %v777_v38 = vadd.f32 -2.0357141, %v552_v37  ;;  %628 = vst.msk [vmem:[%s232_s17 + $0x20] sm:$0xff] %vm371_vm1, %v783_v41 }
 0x14f   : > { %556 = vst.msk [vmem:[%s232_s17 + $0x10] sm:$0xff] %vm371_vm1, %v777_v38 }
 0x150   : > { %v621_v45 = vpop.f32.mrf.mxu1 }
 0x151   : > { %v625_v46 = vmul.f32 4.4444447, %v621_v45 }
 0x152   : > { %v549_v42 = vpop.f32.mrf.mxu3 }
 0x153   : > { %v553_v43 = vmul.f32 4.4642854, %v549_v42  ;;  %v784_v47 = vadd.f32 -1.8044444, %v625_v46 }
 0x155   : > { %v778_v44 = vadd.f32 -2.0357141, %v553_v43  ;;  %629 = vst.msk [vmem:[%s232_s17 + $0x28] sm:$0xff] %vm371_vm1, %v784_v47 }
 0x157   : > { %557 = vst.msk [vmem:[%s232_s17 + $0x18] sm:$0xff] %vm371_vm1, %v778_v44 }
 0x1b7   : > { %v511_v48 = vpop.f32.mrf.mxu2 }
 0x1b8   : > { %v514_v49 = vmul.f32 4.366812, %v511_v48 }
 0x1ba   : > { %v774_v50 = vadd.f32 -2.117904, %v514_v49 }
 0x1bc   : > { %516 = vst.msk [vmem:[%s237_s22] sm:$0xff] %vm432_vm2, %v774_v50 }
 0x1bf   : > { %v583_v51 = vpop.f32.mrf.mxu2 }
 0x1c0   : > { %v586_v52 = vmul.f32 4.4642854, %v583_v51 }
 0x1c2   : > { %v780_v53 = vadd.f32 -2.0357141, %v586_v52 }
 0x1c4   : > { %588 = vst.msk [vmem:[%s237_s22 + $0x8] sm:$0xff] %vm432_vm2, %v780_v53 }
 0x1c7   : > { %v655_v54 = vpop.f32.mrf.mxu2 }
 0x1c8   : > { %v658_v55 = vmul.f32 4.4444447, %v655_v54 }
 0x1ca   : > { %v786_v56 = vadd.f32 -1.8044444, %v658_v55 }
 0x1cc   : > { %660 = vst.msk [vmem:[%s237_s22 + $0x10] sm:$0xff] %vm432_vm2, %v786_v56 }
 0x1cd PF: > { %s16_s18 = sadd.s32 1, %s814_s18  }
 0x1ce   : > { %p13_p4 = scmp.ge.s32.totalorder %s16_s18, 4  }
 0x1d0   :  { %15 = sbr.rel (!%p13_p4) target bundleno = 1 (0x1), region = 78 }

</bundles_post_ra>
